<compile_context>
chip_gen: v5e
topology: v5e:2x2
jax: 0.10.0
libtpu: 0.0.40
codegen_flags: <defaults>
</compile_context>

<pallas_src>
import functools

import jax
import jax.numpy as jnp
from jax.experimental import pallas as pl
from jax.experimental.pallas import tpu as pltpu


def _round_up(x, m):
    return ((x + m - 1) // m) * m


def _fixnorm_kernel(x_ref, o_ref, *, eps, low_precision_scale):
    x = x_ref[...]                                    # (tr, H) native dtype
    x32 = x.astype(jnp.float32)
    sq = jnp.sum(x32 * x32, axis=-1, keepdims=True)   # f32 accumulation, (tr, 1)
    # Reciprocal on the EUP slot instead of expanding a divide into VALU ops.
    inv = pl.reciprocal(jnp.sqrt(sq) + eps, approx=True)
    if low_precision_scale:
        # bf16 inputs: scale in bf16 (native on v6e/v7x VPU) -> half the vreg
        # pressure; only the reduction above needs the f32 copy.
        y = x * inv.astype(x.dtype)
    else:
        y = x32 * inv
    o_ref[...] = y.astype(o_ref.dtype)


def _fixnorm_kernel_bias(x_ref, b_ref, o_ref, *, eps, low_precision_scale):
    x = x_ref[...]
    x32 = x.astype(jnp.float32)
    sq = jnp.sum(x32 * x32, axis=-1, keepdims=True)
    inv = pl.reciprocal(jnp.sqrt(sq) + eps, approx=True)
    b = b_ref[...]                                    # (1, H), VMEM-resident (untiled)
    if low_precision_scale:
        y = x * inv.astype(x.dtype) + b.astype(x.dtype)
    else:
        y = x32 * inv + b.astype(jnp.float32)
    o_ref[...] = y.astype(o_ref.dtype)


def fixnorm(x, bias=None, eps=1e-5, *, block_rows=None):
    """FixNorm over the last dimension of `x` (any leading dims).

    Note: H maps to the 128-lane axis; for best store bandwidth H should be a
    multiple of 128 (small H works correctly but underutilizes lanes).
    """
    orig_shape = x.shape
    H = orig_shape[-1]
    R = 1
    for d in orig_shape[:-1]:
        R *= d
    x2 = x.reshape(R, H)
    itemsize = jnp.dtype(x.dtype).itemsize

    # ---- Per-generation tile sizing (128 MiB VMEM on v5e/v6e, 64 MiB on v7x).
    try:
        vmem_cap = pltpu.get_tpu_info().vmem_capacity_bytes
    except Exception:
        vmem_cap = 64 * 1024 * 1024  # conservative fallback (v7x per-TC)

    if block_rows is None:
        # Per row of tile: double-buffered input + output block (native dtype)
        # plus ~2 f32 working copies inside the kernel body.
        per_row = H * (4 * itemsize + 2 * 4)
        budget = vmem_cap // 2  # headroom for regalloc / pipeline bookkeeping
        block_rows = max(8, min(1024, (budget // per_row) // 8 * 8))
    block_rows = max(8, _round_up(block_rows, 8))
    block_rows = min(block_rows, _round_up(R, 8))  # never exceed (padded) rows

    # Scoped VMEM limit sized for the chosen tile: the default scoped limit
    # (16 MiB v5e / 32 MiB v6e,v7x) would otherwise reject larger tiles.
    vmem_limit = 4 * block_rows * H * itemsize + 2 * block_rows * H * 4 + (4 << 20)
    vmem_limit = int(max(16 << 20, min(vmem_limit, vmem_cap * 9 // 10)))

    # ---- Handle row counts that don't divide the tile: pad with zero rows
    # (0 / (0 + eps) = 0, so padded rows are harmless) and slice afterwards.
    R_pad = _round_up(R, block_rows)
    if R_pad != R:
        x2 = jnp.pad(x2, ((0, R_pad - R), (0, 0)))
    grid = (R_pad // block_rows,)

    low_precision_scale = (x.dtype == jnp.bfloat16)

    x_spec = pl.BlockSpec((block_rows, H), lambda i: (i, 0))
    o_spec = pl.BlockSpec((block_rows, H), lambda i: (i, 0))
    cparams = pltpu.CompilerParams(
        # "parallel" lets v7x shard the row grid across its 2 TensorCores;
        # neutral on single-TC v5e/v6e.
        dimension_semantics=("parallel",),
        vmem_limit_bytes=vmem_limit,
    )

    if bias is not None:
        b2 = bias.reshape(1, H)
        # Whole (tiny) bias kept resident in VMEM, untiled -> no per-step DMA.
        b_spec = pl.BlockSpec(memory_space=pltpu.MemorySpace.VMEM)
        kernel = functools.partial(
            _fixnorm_kernel_bias, eps=eps, low_precision_scale=low_precision_scale)
        out = pl.pallas_call(
            kernel,
            out_shape=jax.ShapeDtypeStruct((R_pad, H), x.dtype),
            grid=grid,
            in_specs=[x_spec, b_spec],
            out_specs=o_spec,
            compiler_params=cparams,
        )(x2, b2)
    else:
        kernel = functools.partial(
            _fixnorm_kernel, eps=eps, low_precision_scale=low_precision_scale)
        out = pl.pallas_call(
            kernel,
            out_shape=jax.ShapeDtypeStruct((R_pad, H), x.dtype),
            grid=grid,
            in_specs=[x_spec],
            out_specs=o_spec,
            compiler_params=cparams,
        )(x2)

    if R_pad != R:
        out = out[:R]
    return out.reshape(orig_shape)


if __name__ == "__main__":
    key = jax.random.PRNGKey(0)
    eps = 1e-5

    batch, seq, hidden = 2, 8, 32          # normalized_shape = (hidden,)
    x = jax.random.normal(key, (batch, seq, hidden), dtype=jnp.float32)

    # FixNorm.reset_parameters(): bias initialized to zeros (bias=True path).
    bias = jnp.zeros((hidden,), dtype=jnp.float32)

    y_nobias = fixnorm(x, bias=None, eps=eps)      # bias=False (module default)
    y_bias = fixnorm(x, bias=bias, eps=eps)        # bias=True
    jax.block_until_ready(y_nobias)
    jax.block_until_ready(y_bias)

    ref = x / (jnp.linalg.norm(x, axis=-1, keepdims=True) + eps)
    # approx reciprocal (EUP) has ~1e-3-level relative error -> relaxed tolerance.
    assert jnp.allclose(y_nobias, ref, atol=3e-3, rtol=3e-3)
    assert jnp.allclose(y_bias, ref + bias, atol=3e-3, rtol=3e-3)
    assert y_nobias.shape == x.shape and y_nobias.dtype == x.dtype

    # bf16 + non-divisible row count (exercises the low-precision scale path
    # and the padded tail tile).
    x16 = jax.random.normal(jax.random.PRNGKey(1), (3, 5, hidden), dtype=jnp.bfloat16)
    y16 = jax.block_until_ready(fixnorm(x16, bias=None, eps=eps))
    x16f = x16.astype(jnp.float32)
    ref16 = x16f / (jnp.linalg.norm(x16f, axis=-1, keepdims=True) + eps)
    assert jnp.allclose(y16.astype(jnp.float32), ref16, atol=2e-2, rtol=2e-2)
    assert y16.shape == x16.shape and y16.dtype == x16.dtype

    print("KERNEL_OK")
</pallas_src>

<mosaic_0001>
module attributes {stable_mosaic.version = 11 : i64} {
  func.func @_fixnorm_kernel(%arg0: i32, %arg1: memref<16x32xf32, #tpu.memory_space<vmem>>, %arg2: memref<16x32xf32, #tpu.memory_space<vmem>>) attributes {dimension_semantics = [#tpu.dimension_semantics<parallel>], iteration_bounds = array<i64: 1>, scalar_prefetch = 0 : i64, scratch_operands = 0 : i64, tpu.core_type = #tpu.core_type<tc>, window_params = [{transform_indices = @transform_0, window_bounds = array<i64: 16, 32>}, {transform_indices = @transform_1, window_bounds = array<i64: 16, 32>}]} {
    %c0 = arith.constant 0 : index
    %c0_0 = arith.constant 0 : index
    %0 = vector.load %arg1[%c0, %c0_0] : memref<16x32xf32, #tpu.memory_space<vmem>>, vector<16x32xf32>
    %1 = arith.mulf %0, %0 : vector<16x32xf32>
    %cst = arith.constant dense<0.000000e+00> : vector<16xf32>
    %2 = vector.multi_reduction <add>, %1, %cst [1] : vector<16x32xf32> to vector<16xf32>
    %3 = vector.shape_cast %2 : vector<16xf32> to vector<16x1xf32>
    %4 = math.sqrt %3 : vector<16x1xf32>
    %cst_1 = arith.constant 9.99999974E-6 : f32
    %5 = vector.broadcast %cst_1 : f32 to vector<16x1xf32>
    %6 = arith.addf %4, %5 : vector<16x1xf32>
    %7 = tpu.reciprocal %6 {approx = true} : vector<16x1xf32> -> vector<16x1xf32>
    %8 = vector.broadcast %7 : vector<16x1xf32> to vector<16x32xf32>
    %9 = arith.mulf %0, %8 : vector<16x32xf32>
    %c0_2 = arith.constant 0 : index
    %c0_3 = arith.constant 0 : index
    %10 = vector.load %arg2[%c0_2, %c0_3] : memref<16x32xf32, #tpu.memory_space<vmem>>, vector<16x32xf32>
    tpu.vector_store %arg2[%c0_2, %c0_3], %9 {strides = array<i32>} : memref<16x32xf32, #tpu.memory_space<vmem>>, vector<16x32xf32>,
    return
  }
  func.func @transform_0(%arg0: i32) -> (i32, i32) {
    %c0_i32 = arith.constant 0 : i32
    %c0_i32_0 = arith.constant 0 : i32
    return %arg0, %c0_i32 : i32, i32
  }
  func.func @transform_1(%arg0: i32) -> (i32, i32) {
    %c0_i32 = arith.constant 0 : i32
    %c0_i32_0 = arith.constant 0 : i32
    return %arg0, %c0_i32 : i32, i32
  }
}

</mosaic_0001>

<bundles_post_ra>
// kernel: tpu_custom_call.1
= control target key start
LH: loop header
LB: loop body
LE: loop exit
PB: predicated region body
PF: predicated region fallthrough
CT: control target
= control target key end

     0   :  { %6 = vsyncpa [#allocation3], 0  ;;  %s181_s0 = inlined_call_operand.hbm [shape: f32[16,32], index: 0, kind: input, shape index: {}]   ;;  %s182_s1 = inlined_call_operand.hbm [shape: f32[16,32], index: 1, kind: output, shape index: {}]  }
   0x1   :  { %7 = vsyncpa [#allocation4], 0  ;;  %s12_s8 = sshll.u32 %s181_s0, 4  ;;  %s151_s9 = smov [#allocation2]   ;;  %s13_s8 = int_to_ptr.hbm [resolvable:$true] %s12_s8 }
   0x2   :  { %s14_s10 = sshll.u32 %s151_s9, 4  ;;  %s152_s11 = smov 128   ;;  %s15_s10 = int_to_ptr.vmem [resolvable:$true] %s14_s10 }
   0x3   :  { %s153_s12 = smov 8  }
   0x4   :  { %20 = dma.hbm_to_vmem [thread:$0]  %s13_s8, 256, %s15_s10, [#allocation3], %s152_s11, %s152_s11, %s153_s12  }
   0x5   :  { %147 = dma.done.wait [#allocation3], 256  }
   0x6   :  { %148 = vsyncadd [#allocation3], 4294967040  ;;  %v25_v0 = vld [vmem:[#allocation2] sm:$0xff]  ;;  %vm29_vm0 = vcmask 261120   ;;  %v26_v2 = vld [vmem:[#allocation2 + $0x8] sm:$0xff]  ;;  %s154_s0 = smov [#allocation5]  }
   0x7   :  { %v27_v1 = vmul.f32 %v25_v0, %v25_v0  ;;  %v28_v4 = vmul.f32 %v26_v2, %v26_v2  ;;  %s72_s13 = sshll.u32 %s154_s0, 4  ;;  %s74_s16 = sshll.u32 %s182_s1, 4  ;;  %s73_s13 = int_to_ptr.vmem [resolvable:$true] %s72_s13  ;;  %s75_s16 = int_to_ptr.hbm [resolvable:$true] %s74_s16 }
   0x9   :  { %v30_v3 = vsel %vm29_vm0, %v27_v1, 0.0  ;;  %v33_v5 = vsel %vm29_vm0, %v28_v4, 0.0 }
   0xa   :  { %31 = vadd.xlane.f32.xlu0 %v30_v3 }
  0x12   :  { %34 = vadd.xlane.f32.xlu0 %v33_v5 }
  0x7d   :  { %v32_v6 = vpop.xlane.xlu0 %31 }
  0x7e   :  { %91 = vrsqrt.f32 %v32_v6  ;;  %vm43_vm1 = vcmp.eq.f32.partialorder %v32_v6, inf  ;;  %v46_v18 = vand.u32 2147483648, %v32_v6  ;;  %vm45_vm2 = vcmp.eq.f32.partialorder %v32_v6, 0.0 }
  0x84   :  { %v92_v7 = vpop.eup %91 }
  0x85   :  { %v37_v8 = vmul.f32 %v92_v7, %v32_v6  ;;  %v35_v9 = vpop.xlane.xlu0 %34 }
  0x86   :  { %93 = vrsqrt.f32 %v35_v9  ;;  %vm55_vm3 = vcmp.eq.f32.partialorder %v35_v9, inf  ;;  %v58_v26 = vand.u32 2147483648, %v35_v9  ;;  %vm57_vm4 = vcmp.eq.f32.partialorder %v35_v9, 0.0 }
  0x87   :  { %v38_v10 = vmul.f32 %v92_v7, %v37_v8 }
  0x89   :  { %v39_v11 = vmul.f32 0.5, %v38_v10 }
  0x8b   :  { %v40_v12 = vsub.f32 1.5, %v39_v11 }
  0x8c   :  { %v94_v13 = vpop.eup %93 }
  0x8d   :  { %v41_v14 = vmul.f32 %v92_v7, %v40_v12  ;;  %v49_v15 = vmul.f32 %v94_v13, %v35_v9 }
  0x8f   :  { %v42_v16 = vmul.f32 %v41_v14, %v32_v6  ;;  %v50_v17 = vmul.f32 %v94_v13, %v49_v15 }
  0x91   :  { %v44_v19 = vsel %vm43_vm1, %v32_v6, %v42_v16  ;;  %v51_v20 = vmul.f32 0.5, %v50_v17 }
  0x92   :  { %v47_v21 = vsel %vm45_vm2, %v46_v18, %v44_v19 }
  0x93   :  { %v52_v22 = vsub.f32 1.5, %v51_v20  ;;  %v60_v23 = vadd.f32 1e-05, %v47_v21 }
  0x95   :  { %v53_v24 = vmul.f32 %v94_v13, %v52_v22  ;;  %95 = vrcp.f32 %v60_v23 }
  0x97   :  { %v54_v25 = vmul.f32 %v53_v24, %v35_v9 }
  0x99   :  { %v56_v27 = vsel %vm55_vm3, %v35_v9, %v54_v25 }
  0x9a   :  { %v59_v28 = vsel %vm57_vm4, %v58_v26, %v56_v27 }
  0x9b   :  { %v96_v29 = vpop.eup %95  ;;  %v61_v30 = vadd.f32 1e-05, %v59_v28 }
  0x9c   :  { %v64_v31 = vmul.f32 %v96_v29, %v25_v0 }
  0x9d   :  { %97 = vrcp.f32 %v61_v30 }
  0x9e   :  { %66 = vst.msk [vmem:[#allocation5] sm:$0xff] %vm29_vm0, %v64_v31 }
  0xa3   :  { %v98_v32 = vpop.eup %97 }
  0xa4   :  { %v65_v33 = vmul.f32 %v98_v32, %v26_v2 }
  0xa6   :  { %67 = vst.msk [vmem:[#allocation5 + $0x8] sm:$0xff] %vm29_vm0, %v65_v33 }
  0xa7   :  { %80 = dma.vmem_to_hbm [thread:$0]  %s73_s13, 256, %s75_s16, [#allocation4], %s152_s11, %s152_s11, %s153_s12  }
  0xa8   :  { %149 = dma.done.wait [#allocation4], 256  }
  0xa9   :  { %150 = vsyncadd [#allocation4], 4294967040 }
  0xaa   :  { %85 = vsyncpa [#allocation3], 1 }
  0xab   :  { %86 = vsyncpa [#allocation4], 1 }

</bundles_post_ra>
